<compile_context>
chip_gen: v7x
topology: tpu7x:2x2x1
jax: 0.10.0
libtpu: 0.0.40
codegen_flags: <defaults>
</compile_context>

<pallas_src>
import functools

import jax
import jax.numpy as jnp
from jax import lax
from jax.experimental import pallas as pl
from jax.experimental.pallas import tpu as pltpu

COMMITMENT_COST = 0.25


def _round_up(x, m):
    return ((x + m - 1) // m) * m


def _vq_compression_kernel(x_ref, wpre_ref, bpre_ref, embn2_ref, esq_ref,
                           w2_ref, bpost_ref,
                           xrec_ref, losssum_ref, counts_ref,
                           *, hw_valid, block_hw, apply_mask):
    K = embn2_ref.shape[0]

    x = x_ref[0].astype(jnp.float32)                                       # (C, T)

    # ---- pre-VQ 1x1 conv:  z = Wpre @ x + bpre  -> (D, T) ----
    z = jnp.dot(wpre_ref[...], x, preferred_element_type=jnp.float32) + bpre_ref[...]

    # ---- squared distances ||e||^2 + ||z||^2 - 2 e.z (the -2 is folded into
    # the codebook operand in the wrapper) -> (K, T) ----
    z_sq = jnp.sum(z * z, axis=0, keepdims=True)                           # (1, T)
    ez2 = jnp.dot(embn2_ref[...], z, preferred_element_type=jnp.float32)   # (K, T) = -2 E z
    d = ez2 + esq_ref[...] + z_sq                                          # VPU broadcasts

    # ---- argmin over the codebook (sublane) axis; first occurrence like torch.argmin ----
    dmin = jnp.min(d, axis=0, keepdims=True)                               # (1, T)
    row = lax.broadcasted_iota(jnp.int32, d.shape, 0)                      # (K, T)
    idx = jnp.min(jnp.where(d <= dmin, row, K), axis=0, keepdims=True)
    enc = (row == idx).astype(jnp.float32)                                 # one-hot (K, T)

    # ---- per-block partial reductions (finished in the wrapper) ----
    # loss numerator == sum of min distances == sum ||e_idx - z||^2
    if apply_mask:
        col = (pl.program_id(1) * block_hw
               + lax.broadcasted_iota(jnp.int32, (1, block_hw), 1))
        valid = (col < hw_valid).astype(jnp.float32)                       # (1, T)
        dmin = dmin * valid
        enc_cnt = enc * valid
    else:
        enc_cnt = enc
    losssum_ref[...] = jnp.sum(dmin, axis=(0, 1), keepdims=True).reshape(1, 1, 1, 1)
    counts_ref[...] = jnp.sum(enc_cnt, axis=1, keepdims=True).reshape(1, 1, K, 1)

    # ---- straight-through forward value == quantized; fused post-VQ conv:
    #      xrec = (Wpost @ E^T) @ one_hot + bpost  -> (C, T) ----
    xrec = jnp.dot(w2_ref[...], enc, preferred_element_type=jnp.float32) + bpost_ref[...]
    xrec_ref[0] = xrec.astype(xrec_ref.dtype)


def compression_forward(x, params, block_hw=2048):
    """x: (N, C, H, W) float32 (PyTorch NCHW). Returns (loss, x_recon, perplexity)."""
    wpre, bpre, emb, wpost, bpost = params
    N, C, H, W = x.shape
    K, D = emb.shape
    HW = H * W
    M = N * HW

    T = min(block_hw, _round_up(HW, 128))
    G = -(-HW // T)
    HWp = G * T
    apply_mask = (HWp != HW)

    # NCHW -> (N, C, HW): pure reshape, no data movement.
    x3 = x.reshape(N, C, HW)
    if apply_mask:
        x3 = jnp.pad(x3, ((0, 0), (0, 0), (0, HWp - HW)))

    # Tiny precomputed weights (one-time cost, saves per-block work in-kernel).
    emb_neg2 = (-2.0) * emb                                  # (K, D)
    e_sq = jnp.sum(emb * emb, axis=1, keepdims=True)         # (K, 1)
    w2 = wpost @ emb.T                                       # (C, K)  fused post-conv ∘ lookup

    kernel = functools.partial(_vq_compression_kernel,
                               hw_valid=HW, block_hw=T, apply_mask=apply_mask)

    flops = 2 * M * (C * D + D * K + K * C)
    bytes_accessed = 4 * (2 * M * C + 2 * K * D + K + C * K + D * C + D + C)

    xrec3, loss_parts, counts = pl.pallas_call(
        kernel,
        grid=(N, G),
        in_specs=[
            pl.BlockSpec((1, C, T), lambda n, g: (n, 0, g)),  # x (N, C, HWp), tiled over HW
            pl.BlockSpec((D, C), lambda n, g: (0, 0)),        # Wpre       (resident)
            pl.BlockSpec((D, 1), lambda n, g: (0, 0)),        # bpre       (resident)
            pl.BlockSpec((K, D), lambda n, g: (0, 0)),        # -2*E       (resident)
            pl.BlockSpec((K, 1), lambda n, g: (0, 0)),        # ||e||^2    (resident)
            pl.BlockSpec((C, K), lambda n, g: (0, 0)),        # Wpost@E^T  (resident)
            pl.BlockSpec((C, 1), lambda n, g: (0, 0)),        # bpost      (resident)
        ],
        out_specs=(
            pl.BlockSpec((1, C, T), lambda n, g: (n, 0, g)),       # x_recon (N, C, HWp)
            pl.BlockSpec((1, 1, 1, 1), lambda n, g: (n, g, 0, 0)), # per-block loss sum
            pl.BlockSpec((1, 1, K, 1), lambda n, g: (n, g, 0, 0)), # per-block code counts
        ),
        out_shape=(
            jax.ShapeDtypeStruct((N, C, HWp), jnp.float32),
            jax.ShapeDtypeStruct((N, G, 1, 1), jnp.float32),
            jax.ShapeDtypeStruct((N, G, K, 1), jnp.float32),
        ),
        compiler_params=pltpu.CompilerParams(
            dimension_semantics=("parallel", "parallel")),
        cost_estimate=pl.CostEstimate(flops=flops, transcendentals=0,
                                      bytes_accessed=bytes_accessed),
    )(x3, wpre, bpre, emb_neg2, e_sq, w2, bpost)

    # tiny final reductions in the wrapper (keeps both grid axes "parallel")
    loss = COMMITMENT_COST * jnp.sum(loss_parts) / jnp.float32(M * D)
    avg_probs = jnp.sum(counts, axis=(0, 1, 3)) / jnp.float32(M)           # (K,)
    perplexity = jnp.exp(-jnp.sum(avg_probs * jnp.log(avg_probs + 1e-10)))

    x_recon = xrec3[:, :, :HW].reshape(N, C, H, W)                         # free reshape
    return loss, x_recon, perplexity


def _reference(x, params):
    """Pure-JAX reference replicating the PyTorch forward semantics."""
    wpre, bpre, emb, wpost, bpost = params
    N, C, H, W = x.shape
    xf = jnp.transpose(x, (0, 2, 3, 1)).reshape(-1, C)
    z = xf @ wpre.T + bpre[:, 0]
    dist = (jnp.sum(z ** 2, axis=1, keepdims=True)
            + jnp.sum(emb ** 2, axis=1) - 2.0 * z @ emb.T)
    idx = jnp.argmin(dist, axis=1)
    enc = jax.nn.one_hot(idx, emb.shape[0], dtype=jnp.float32)
    q = enc @ emb
    loss = COMMITMENT_COST * jnp.mean((q - z) ** 2)
    avg = jnp.mean(enc, axis=0)
    perp = jnp.exp(-jnp.sum(avg * jnp.log(avg + 1e-10)))
    xr = (q @ wpost.T + bpost[:, 0]).reshape(N, H, W, C).transpose(0, 3, 1, 2)
    return loss, xr, perp


if __name__ == "__main__":
    # small shapes consistent with the module:
    #   input_encoder_channels=4, embedding_dim=16, num_embeddings=32
    N, C, H, W = 2, 4, 16, 16
    NUM_EMBEDDINGS, EMBEDDING_DIM = 32, 16

    key = jax.random.PRNGKey(0)
    kx, k1, k2, k3, k4, k5 = jax.random.split(key, 6)
    x = jax.random.normal(kx, (N, C, H, W), jnp.float32)

    # Conv2d 1x1 weights in (out, in) form (natural for the transposed layout);
    # biases stored as (out, 1) columns.
    wpre = 0.3 * jax.random.normal(k1, (EMBEDDING_DIM, C), jnp.float32)
    bpre = 0.1 * jax.random.normal(k2, (EMBEDDING_DIM, 1), jnp.float32)
    emb = jax.random.normal(k3, (NUM_EMBEDDINGS, EMBEDDING_DIM), jnp.float32)  # codebook ~ N(0,1)
    wpost = 0.3 * jax.random.normal(k4, (C, EMBEDDING_DIM), jnp.float32)
    bpost = 0.1 * jax.random.normal(k5, (C, 1), jnp.float32)
    params = (wpre, bpre, emb, wpost, bpost)

    loss, x_recon, perplexity = compression_forward(x, params)
    jax.block_until_ready((loss, x_recon, perplexity))

    loss_r, x_recon_r, perp_r = _reference(x, params)
    assert jnp.allclose(loss, loss_r, rtol=1e-4, atol=1e-4), (loss, loss_r)
    assert jnp.allclose(perplexity, perp_r, rtol=1e-4, atol=1e-4), (perplexity, perp_r)
    assert jnp.allclose(x_recon, x_recon_r, rtol=1e-4, atol=1e-4)

    print("KERNEL_OK")
</pallas_src>

<mosaic_0001>
module attributes {stable_mosaic.version = 11 : i64} {
  func.func @_vq_compression_kernel(%arg0: i32, %arg1: i32, %arg2: memref<1x4x256xf32, #tpu.memory_space<vmem>>, %arg3: memref<16x4xf32, #tpu.memory_space<vmem>>, %arg4: memref<16x1xf32, #tpu.memory_space<vmem>>, %arg5: memref<32x16xf32, #tpu.memory_space<vmem>>, %arg6: memref<32x1xf32, #tpu.memory_space<vmem>>, %arg7: memref<4x32xf32, #tpu.memory_space<vmem>>, %arg8: memref<4x1xf32, #tpu.memory_space<vmem>>, %arg9: memref<1x4x256xf32, #tpu.memory_space<vmem>>, %arg10: memref<1x1x1x1xf32, #tpu.memory_space<vmem>>, %arg11: memref<1x1x32x1xf32, #tpu.memory_space<vmem>>) attributes {dimension_semantics = [#tpu.dimension_semantics<parallel>, #tpu.dimension_semantics<parallel>], iteration_bounds = array<i64: 2, 1>, scalar_prefetch = 0 : i64, scratch_operands = 0 : i64, tpu.core_type = #tpu.core_type<tc>, window_params = [{transform_indices = @transform_0, window_bounds = array<i64: 1, 4, 256>}, {pipeline_mode = #tpu.pipeline_mode<synchronous>, transform_indices = @transform_1, window_bounds = array<i64: 16, 4>}, {pipeline_mode = #tpu.pipeline_mode<synchronous>, transform_indices = @transform_2, window_bounds = array<i64: 16, 1>}, {pipeline_mode = #tpu.pipeline_mode<synchronous>, transform_indices = @transform_3, window_bounds = array<i64: 32, 16>}, {pipeline_mode = #tpu.pipeline_mode<synchronous>, transform_indices = @transform_4, window_bounds = array<i64: 32, 1>}, {pipeline_mode = #tpu.pipeline_mode<synchronous>, transform_indices = @transform_5, window_bounds = array<i64: 4, 32>}, {pipeline_mode = #tpu.pipeline_mode<synchronous>, transform_indices = @transform_6, window_bounds = array<i64: 4, 1>}, {transform_indices = @transform_7, window_bounds = array<i64: 1, 4, 256>}, {transform_indices = @transform_8, window_bounds = array<i64: 1, 1, 1, 1>}, {transform_indices = @transform_9, window_bounds = array<i64: 1, 1, 32, 1>}]} {
    %c0 = arith.constant 0 : index
    %c0_0 = arith.constant 0 : index
    %c0_1 = arith.constant 0 : index
    %0 = vector.load %arg2[%c0, %c0_0, %c0_1] : memref<1x4x256xf32, #tpu.memory_space<vmem>>, vector<1x4x256xf32>
    %1 = vector.shape_cast %0 : vector<1x4x256xf32> to vector<4x256xf32>
    %c0_2 = arith.constant 0 : index
    %c0_3 = arith.constant 0 : index
    %2 = vector.load %arg3[%c0_2, %c0_3] : memref<16x4xf32, #tpu.memory_space<vmem>>, vector<16x4xf32>
    %cst = arith.constant dense<0.000000e+00> : vector<16x256xf32>
    %3 = tpu.matmul %2, %1, %cst {dimension_numbers = #tpu.dot_dimension_numbers<[1], [0], [0], [1], [0, 0, 1, 1], [], []>} : vector<16x4xf32>, vector<4x256xf32>, vector<16x256xf32> -> vector<16x256xf32>
    %c0_4 = arith.constant 0 : index
    %c0_5 = arith.constant 0 : index
    %4 = vector.load %arg4[%c0_4, %c0_5] : memref<16x1xf32, #tpu.memory_space<vmem>>, vector<16x1xf32>
    %5 = vector.broadcast %4 : vector<16x1xf32> to vector<16x256xf32>
    %6 = arith.addf %3, %5 : vector<16x256xf32>
    %7 = arith.mulf %6, %6 : vector<16x256xf32>
    %cst_6 = arith.constant dense<0.000000e+00> : vector<256xf32>
    %8 = vector.multi_reduction <add>, %7, %cst_6 [0] : vector<16x256xf32> to vector<256xf32>
    %9 = vector.shape_cast %8 : vector<256xf32> to vector<1x256xf32>
    %c0_7 = arith.constant 0 : index
    %c0_8 = arith.constant 0 : index
    %10 = vector.load %arg5[%c0_7, %c0_8] : memref<32x16xf32, #tpu.memory_space<vmem>>, vector<32x16xf32>
    %cst_9 = arith.constant dense<0.000000e+00> : vector<32x256xf32>
    %11 = tpu.matmul %10, %6, %cst_9 {dimension_numbers = #tpu.dot_dimension_numbers<[1], [0], [0], [1], [0, 0, 1, 1], [], []>} : vector<32x16xf32>, vector<16x256xf32>, vector<32x256xf32> -> vector<32x256xf32>
    %c0_10 = arith.constant 0 : index
    %c0_11 = arith.constant 0 : index
    %12 = vector.load %arg6[%c0_10, %c0_11] : memref<32x1xf32, #tpu.memory_space<vmem>>, vector<32x1xf32>
    %13 = vector.broadcast %12 : vector<32x1xf32> to vector<32x256xf32>
    %14 = arith.addf %11, %13 : vector<32x256xf32>
    %15 = vector.broadcast %9 : vector<1x256xf32> to vector<32x256xf32>
    %16 = arith.addf %14, %15 : vector<32x256xf32>
    %cst_12 = arith.constant dense<0x7F800000> : vector<256xf32>
    %17 = vector.multi_reduction <minimumf>, %16, %cst_12 [0] : vector<32x256xf32> to vector<256xf32>
    %18 = vector.shape_cast %17 : vector<256xf32> to vector<1x256xf32>
    %19 = tpu.iota {dimensions = array<i32: 0>} : vector<32x256xi32>
    %20 = vector.broadcast %18 : vector<1x256xf32> to vector<32x256xf32>
    %21 = arith.cmpf ole, %16, %20 : vector<32x256xf32>
    %c32_i32 = arith.constant 32 : i32
    %22 = vector.broadcast %c32_i32 : i32 to vector<32x256xi32>
    %23 = arith.select %21, %19, %22 : vector<32x256xi1>, vector<32x256xi32>
    %cst_13 = arith.constant dense<2147483647> : vector<256xi32>
    %24 = vector.multi_reduction <minsi>, %23, %cst_13 [0] : vector<32x256xi32> to vector<256xi32>
    %25 = vector.shape_cast %24 : vector<256xi32> to vector<1x256xi32>
    %26 = vector.broadcast %25 : vector<1x256xi32> to vector<32x256xi32>
    %27 = arith.cmpi eq, %19, %26 : vector<32x256xi32>
    %28 = arith.extui %27 : vector<32x256xi1> to vector<32x256xi32>
    %29 = arith.sitofp %28 : vector<32x256xi32> to vector<32x256xf32>
    %30 = vector.shape_cast %18 : vector<1x256xf32> to vector<1x1x256xf32>
    %cst_14 = arith.constant dense<0.000000e+00> : vector<1xf32>
    %31 = vector.multi_reduction <add>, %30, %cst_14 [1, 2] : vector<1x1x256xf32> to vector<1xf32>
    %32 = vector.shape_cast %31 : vector<1xf32> to vector<1x1x1xf32>
    %33 = vector.extract %32[0, 0, 0] : f32 from vector<1x1x1xf32>
    %34 = vector.broadcast %33 : f32 to vector<1x1xf32>
    %35 = vector.shape_cast %34 : vector<1x1xf32> to vector<1x1x1x1xf32>
    %c0_15 = arith.constant 0 : index
    %c0_16 = arith.constant 0 : index
    %c0_17 = arith.constant 0 : index
    %c0_18 = arith.constant 0 : index
    %36 = vector.load %arg10[%c0_15, %c0_16, %c0_17, %c0_18] : memref<1x1x1x1xf32, #tpu.memory_space<vmem>>, vector<1x1x1x1xf32>
    tpu.vector_store %arg10[%c0_15, %c0_16, %c0_17, %c0_18], %35 {strides = array<i32>} : memref<1x1x1x1xf32, #tpu.memory_space<vmem>>, vector<1x1x1x1xf32>,
    %cst_19 = arith.constant dense<0.000000e+00> : vector<32xf32>
    %37 = vector.multi_reduction <add>, %29, %cst_19 [1] : vector<32x256xf32> to vector<32xf32>
    %38 = vector.shape_cast %37 : vector<32xf32> to vector<32x1xf32>
    %39 = vector.shape_cast %38 : vector<32x1xf32> to vector<1x1x32x1xf32>
    %c0_20 = arith.constant 0 : index
    %c0_21 = arith.constant 0 : index
    %c0_22 = arith.constant 0 : index
    %c0_23 = arith.constant 0 : index
    %40 = vector.load %arg11[%c0_20, %c0_21, %c0_22, %c0_23] : memref<1x1x32x1xf32, #tpu.memory_space<vmem>>, vector<1x1x32x1xf32>
    tpu.vector_store %arg11[%c0_20, %c0_21, %c0_22, %c0_23], %39 {strides = array<i32>} : memref<1x1x32x1xf32, #tpu.memory_space<vmem>>, vector<1x1x32x1xf32>,
    %c0_24 = arith.constant 0 : index
    %c0_25 = arith.constant 0 : index
    %41 = vector.load %arg7[%c0_24, %c0_25] : memref<4x32xf32, #tpu.memory_space<vmem>>, vector<4x32xf32>
    %cst_26 = arith.constant dense<0.000000e+00> : vector<4x256xf32>
    %42 = tpu.matmul %41, %29, %cst_26 {dimension_numbers = #tpu.dot_dimension_numbers<[1], [0], [0], [1], [0, 0, 1, 1], [], []>} : vector<4x32xf32>, vector<32x256xf32>, vector<4x256xf32> -> vector<4x256xf32>
    %c0_27 = arith.constant 0 : index
    %c0_28 = arith.constant 0 : index
    %43 = vector.load %arg8[%c0_27, %c0_28] : memref<4x1xf32, #tpu.memory_space<vmem>>, vector<4x1xf32>
    %44 = vector.broadcast %43 : vector<4x1xf32> to vector<4x256xf32>
    %45 = arith.addf %42, %44 : vector<4x256xf32>
    %c0_29 = arith.constant 0 : index
    %c0_30 = arith.constant 0 : index
    %c0_31 = arith.constant 0 : index
    %46 = vector.load %arg9[%c0_29, %c0_30, %c0_31] : memref<1x4x256xf32, #tpu.memory_space<vmem>>, vector<1x4x256xf32>
    %47 = vector.shape_cast %46 : vector<1x4x256xf32> to vector<4x256xf32>
    %48 = vector.shape_cast %45 : vector<4x256xf32> to vector<1x4x256xf32>
    tpu.vector_store %arg9[%c0_29, %c0_30, %c0_31], %48 {strides = array<i32>} : memref<1x4x256xf32, #tpu.memory_space<vmem>>, vector<1x4x256xf32>,
    return
  }
  func.func @transform_0(%arg0: i32, %arg1: i32) -> (i32, i32, i32) {
    %c0_i32 = arith.constant 0 : i32
    %c0_i32_0 = arith.constant 0 : i32
    return %arg0, %c0_i32, %arg1 : i32, i32, i32
  }
  func.func @transform_1(%arg0: i32, %arg1: i32) -> (i32, i32) {
    %c0_i32 = arith.constant 0 : i32
    %c0_i32_0 = arith.constant 0 : i32
    %c0_i32_1 = arith.constant 0 : i32
    return %c0_i32, %c0_i32_0 : i32, i32
  }
  func.func @transform_2(%arg0: i32, %arg1: i32) -> (i32, i32) {
    %c0_i32 = arith.constant 0 : i32
    %c0_i32_0 = arith.constant 0 : i32
    %c0_i32_1 = arith.constant 0 : i32
    return %c0_i32, %c0_i32_0 : i32, i32
  }
  func.func @transform_3(%arg0: i32, %arg1: i32) -> (i32, i32) {
    %c0_i32 = arith.constant 0 : i32
    %c0_i32_0 = arith.constant 0 : i32
    %c0_i32_1 = arith.constant 0 : i32
    return %c0_i32, %c0_i32_0 : i32, i32
  }
  func.func @transform_4(%arg0: i32, %arg1: i32) -> (i32, i32) {
    %c0_i32 = arith.constant 0 : i32
    %c0_i32_0 = arith.constant 0 : i32
    %c0_i32_1 = arith.constant 0 : i32
    return %c0_i32, %c0_i32_0 : i32, i32
  }
  func.func @transform_5(%arg0: i32, %arg1: i32) -> (i32, i32) {
    %c0_i32 = arith.constant 0 : i32
    %c0_i32_0 = arith.constant 0 : i32
    %c0_i32_1 = arith.constant 0 : i32
    return %c0_i32, %c0_i32_0 : i32, i32
  }
  func.func @transform_6(%arg0: i32, %arg1: i32) -> (i32, i32) {
    %c0_i32 = arith.constant 0 : i32
    %c0_i32_0 = arith.constant 0 : i32
    %c0_i32_1 = arith.constant 0 : i32
    return %c0_i32, %c0_i32_0 : i32, i32
  }
  func.func @transform_7(%arg0: i32, %arg1: i32) -> (i32, i32, i32) {
    %c0_i32 = arith.constant 0 : i32
    %c0_i32_0 = arith.constant 0 : i32
    return %arg0, %c0_i32, %arg1 : i32, i32, i32
  }
  func.func @transform_8(%arg0: i32, %arg1: i32) -> (i32, i32, i32, i32) {
    %c0_i32 = arith.constant 0 : i32
    %c0_i32_0 = arith.constant 0 : i32
    %c0_i32_1 = arith.constant 0 : i32
    return %arg0, %arg1, %c0_i32, %c0_i32_0 : i32, i32, i32, i32
  }
  func.func @transform_9(%arg0: i32, %arg1: i32) -> (i32, i32, i32, i32) {
    %c0_i32 = arith.constant 0 : i32
    %c0_i32_0 = arith.constant 0 : i32
    %c0_i32_1 = arith.constant 0 : i32
    return %arg0, %arg1, %c0_i32, %c0_i32_0 : i32, i32, i32, i32
  }
}

</mosaic_0001>

<bundles_post_ra>
// kernel: tpu_custom_call.1
= control target key start
LH: loop header
LB: loop body
LE: loop exit
PB: predicated region body
PF: predicated region fallthrough
CT: control target
= control target key end

     0   :  { %s1542_s0 = inlined_call_operand.vmem [shape: f32[2,4,256], index: 0, kind: input, shape index: {}]   ;;  %s1543_s1 = inlined_call_operand.vmem [shape: f32[16,4], index: 1, kind: input, shape index: {}]   ;;  %s1544_s2 = inlined_call_operand.vmem [shape: f32[16,1], index: 2, kind: input, shape index: {}]   ;;  %s1545_s3 = inlined_call_operand.vmem [shape: f32[32,16], index: 3, kind: input, shape index: {}]   ;;  %s1546_s4 = inlined_call_operand.vmem [shape: f32[32,1], index: 4, kind: input, shape index: {}]   ;;  %s1547_s5 = inlined_call_operand.vmem [shape: f32[4,32], index: 5, kind: input, shape index: {}]   ;;  %s1548_s6 = inlined_call_operand.vmem [shape: f32[4,1], index: 6, kind: input, shape index: {}]   ;;  %s1549_s7 = inlined_call_operand.hbm [shape: f32[2,4,256], index: 7, kind: output, shape index: {0}]   ;;  %s1550_s8 = inlined_call_operand.vmem [shape: f32[2,1,1,1], index: 8, kind: output, shape index: {1}]   ;;  %s1551_s9 = inlined_call_operand.vmem [shape: f32[2,1,32,1], index: 9, kind: output, shape index: {2}]  }
   0x1   :  { %1552 = sst [smem:[#allocation5_spill]] %s1542_s0 }
   0x2   :  { %15 = vsyncpa [#allocation3], 0 }
   0x3   :  { %17 = vsyncpa [#allocation3 + $0x1], 0  ;;  %s1309_s30 = smov 0   ;;  %s1311_s10 = smov 0  }
   0x4   :  { %s1313_s11 = smov 0   ;;  %s1315_s12 = smov 0  }
   0x5   :  { %s1317_s13 = smov 0   ;;  %s1319_s14 = smov 0  }
   0x6 LB: > { %s1057_s15 = sadd.s32 4294967295, %s1253_s14   ;;  %s1058_s16 = sadd.s32 4294967294, %s1253_s14   ;;  %s1253_s14 = sphi %s1319_s14, %s23_s14   ;;  %s1249_s13 = sphi %s1317_s13, %s1560_s13   ;;  %s1245_s12 = sphi %s1315_s12, %s1559_s12   ;;  %s1241_s11 = sphi %s1313_s11, %s1558_s11   ;;  %s1237_s10 = sphi %s1311_s10, %s1557_s10   ;;  %s1233_s30 = sphi %s1309_s30, %s1556_s30  }
   0x7   : > { %s35_s17 = sadd.s32 1, %s1249_s13  ;;  %s198_s18 = sadd.s32 1, %s1241_s11 }
   0x8   : > { %p37_p0 = scmp.ge.s32.totalorder %s35_s17, 2  ;;  %p208_p1 = scmp.ne.s32.totalorder %s1241_s11, %s1237_s10 }
   0x9   : > { %p209_p2 = scmp.eq.s32.totalorder %s1057_s15, 1  ;;  %p214_p3 = scmp.ne.s32.totalorder %s1237_s10, %s1233_s30 }
   0xa   : > { %s1562_s17 = smov (%p37_p0, %s35_s17), 0  ;;  %p215_p5 = scmp.eq.s32.totalorder %s1058_s16, 1 }
   0xb   : > { %p1349_p4 = por %p209_p2, %p208_p1  ;;  %s193_s20 = ssub.s32 %s1249_s13, %s1562_s17 }
   0xc   : > { %p1061_p6 = scmp.ge.s32.totalorder %s1253_s14, 1  ;;  %p196_p7 = scmp.eq.s32.totalorder %s193_s20, 0 }
   0xd   : > { %p1356_p8 = por %p215_p5, %p214_p3  ;;  %p320_p9 = scmp.lt.s32.totalorder %s1253_s14, 3 }
   0xe   : > { %s1362_s22 = scalar_select %p196_p7, %s1241_s11, %s198_s18  }
   0xf   : > { %p321_p10 = pnand %p1061_p6, %p320_p9 }
  0x10   : > { %p376_p11 = scmp.lt.s32.totalorder (!%p321_p10), %s1245_s12, 1  ;;  %v1255_v0 = vmov (!%p321_p10), 0.0   ;;  %v404_v1 = vld [vmem:[%s1544_s2] sm:$0xff] (!%p321_p10)  ;;  %v1256_v2 = vmov (!%p321_p10), 0   ;;  %v405_v3 = vld [vmem:[%s1544_s2 + $0x8] sm:$0xff] (!%p321_p10)  ;;  %s1555_s0 = sld [smem:[#allocation5_spill]] (!%p321_p10) }
  0x11   : > { %324 = sbr.rel (%p321_p10) target bundleno = 765 (0x2fd), region = 48  ;;  %494 = vmatprep.mubr.f32.mxu0 (!%p321_p10), %v1255_v0  ;;  %630 = vmatprep.mubr.f32.mxu1 (!%p321_p10), %v1255_v0  ;;  %vm425_vm0 = vcmask (!%p321_p10), 1043456   ;;  %v402_v6 = vld [vmem:[%s1543_s1] sm:$0xff] (!%p321_p10)  ;;  %vm418_vm1 = vcmask (!%p321_p10), 31744   ;;  %v531_v7 = vld [vmem:[%s1546_s4 + $0x10] sm:$0xff] (!%p321_p10)  ;;  %v403_v8 = vld [vmem:[%s1543_s1 + $0x8] sm:$0xff] (!%p321_p10) }
  0x12   : > { %1172 = vset.pattern.permute.xlu0 (!%p321_p10), %v1256_v2  ;;  %1173 = vset.pattern.permute.xlu1 (!%p321_p10), %v1256_v2  ;;  %v529_v9 = vld [vmem:[%s1546_s4] sm:$0xff] (!%p321_p10)  ;;  %v530_v10 = vld [vmem:[%s1546_s4 + $0x8] sm:$0xff] (!%p321_p10)  ;;  %v532_v11 = vld [vmem:[%s1546_s4 + $0x18] sm:$0xff] (!%p321_p10)  ;;  %vm553_vm2 = vcmask (!%p321_p10), 130048   ;;  %vm756_vm3 = vcmask (!%p321_p10), 1040384   ;;  %s353_s23 = sand.u32 (!%p321_p10), 1, %s1237_s10  }
  0x13   : > { %408 = vperm.xlu0 (!%p321_p10), %1172, %v404_v1   ;;  %535 = vperm.xlu1 (!%p321_p10), %1173, %v529_v9   ;;  %v525_v30 = vld [vmem:[%s1545_s3] sm:$0xff] (!%p321_p10)  ;;  %v526_v31 = vld [vmem:[%s1545_s3 + $0x8] sm:$0xff] (!%p321_p10)  ;;  %v527_v32 = vld [vmem:[%s1545_s3 + $0x10] sm:$0xff] (!%p321_p10)  ;;  %s1062_s24 = sshll.u32 (!%p321_p10), %s353_s23, 3  ;;  %s877_s15 = scalar_lea.sflag (!%p321_p10), [#allocation3], %s353_s23 }
  0x14   : > { %v528_v33 = vld [vmem:[%s1545_s3 + $0x18] sm:$0xff] (!%p321_p10)  ;;  %s355_s27 = scalar_lea.vmem (!%p321_p10), [#allocation2], %s1062_s24 }
  0x15   : > { %s908_s28 = sshll.u32 (!%p321_p10), %s355_s27, 4  ;;  %s1497_s28 = int_to_ptr.vmem [resolvable:$true] %s908_s28 }
  0x17   : > { %413 = vperm.xlu0 (!%p321_p10), %1172, %v405_v3   ;;  %540 = vperm.xlu1 (!%p321_p10), %1173, %v530_v10  }
  0x18   : > { %s1371_s25 = scalar_select %p376_p11, %s1245_s12, 1 }
  0x1a   : > { %s1097_s26 = sshll.u32 %s1371_s25, 3  ;;  %s391_s18 = scalar_lea.vmem %s1550_s8, %s1371_s25 }
  0x1b   : > { %s383_s16 = scalar_lea.vmem %s1555_s0, %s1097_s26  ;;  %545 = vperm.xlu0 %1172, %v531_v7   ;;  %550 = vperm.xlu1 %1173, %v532_v11   ;;  %s1098_s26 = sshll.u32 %s1371_s25, 5 }
  0x1c   : > { %v401_v4 = vld [vmem:[%s383_s16] sm:$0xff]  ;;  %s400_s29 = scalar_lea.vmem %s1551_s9, %s1098_s26  ;;  %s1099_s26 = sshll.u32 %s1245_s12, 7 }
  0x1d   : > { %v417_v5 = vcombine.high %v401_v4, %v401_v4  ;;  %s1495_s25 = scalar_lea.hbm %s1549_s7, %s1099_s26  ;;  %s1175_s16 = scalar_lea.vmem %s1497_s28, 128 }
  0x1e   : > { %p1176_p12 = scmp.ne.s32.totalorder %s1497_s28, %s1175_s16  ;;  %s1258_s12 = smov [#allocation2]  }
  0x1f   : > { %1067 = vmatprep.subr.msk.mxu0 %vm425_vm0, %v417_v5 }
  0x20   : > { %1068 = vmatpush1.msk.msra.mxu0 %vm425_vm0, %v401_v4  ;;  %p1177_p13 = pnand %p1176_p12, %p1349_p4 }
  0x21   : > { %1069 = vmatmul.mubr.msk.f32.vlgmr.msra.gmra.mrb[0].mxu0 %vm418_vm1, %v402_v6 }
  0x22   : > { %500 = vmatprep.mubr.f32.mxu0 %v1255_v0  ;;  %p1178_p0 = pneg %p1177_p13 }
  0x25   : > { %1070 = vmatmul.mubr.msk.f32.gmra.mrb[2].mxu0 %vm418_vm1, %v403_v8 }
  0x26   : > { %864 = vmatprep.mubr.f32.mxu0 %v1255_v0 }
  0x92   : > { %v409_v12 = vpop.permute.xlu0 %408  ;;  %v536_v44 = vpop.permute.xlu1 %535 }
  0x96   : > { %v414_v16 = vpop.permute.xlu0 %413  ;;  %v541_v52 = vpop.permute.xlu1 %540 }
  0x9a   : > { %v546_v59 = vpop.permute.xlu0 %545  ;;  %v551_v3 = vpop.permute.xlu1 %550 }
  0xf4   : > { %v496_v13 = vpop.f32.mrb[0].mxu0 }
  0xf5   : > { %v498_v14 = vpop.f32.mrb[1].mxu0  ;;  %v497_v15 = vadd.f32 %v496_v13, %v409_v12 }
  0xf6   : > { %v499_v17 = vadd.f32 %v498_v14, %v409_v12 }
  0xf7   : > { %v507_v22 = vmul.f32 %v497_v15, %v497_v15 }
  0xf8   : > { %v502_v18 = vpop.f32.mrb[2].mxu0  ;;  %v508_v25 = vmul.f32 %v499_v17, %v499_v17 }
  0xf9   : > { %v503_v19 = vadd.f32 %v502_v18, %v414_v16  ;;  %v504_v20 = vpop.f32.mrb[3].mxu0  ;;  %v681_v18 = vlaneseq }
  0xfa   : > { %v505_v21 = vadd.f32 %v504_v20, %v414_v16 }
  0xfb   : > { %v509_v23 = vmul.f32 %v503_v19, %v503_v19  ;;  %v1102_v24 = vpack.c.bf16 %v503_v19, %v497_v15 }
  0xfc   : > { %v510_v26 = vmul.f32 %v505_v21, %v505_v21  ;;  %v1100_v27 = vpack.c.bf16 %v505_v21, %v499_v17 }
  0xfd   : > { %v511_v28 = vadd.f32 %v509_v23, %v507_v22  ;;  %v1418_v23 = vshrl.u32 %v681_v18, 7 }
  0xfe   : > { %v518_v29 = vadd.f32 %v510_v26, %v508_v25  ;;  %1101 = vmatprep.subr.bf16.mxu1 %v1100_v27 }
  0xff   : > { %1103 = vmatpush1.bf16.msra.mxu1 %v1102_v24  ;;  %v512_v34 = vrot.slane %v511_v28, 4 }
 0x100   : > { %v519_v35 = vrot.slane %v518_v29, 4 }
 0x101   : > { %v513_v36 = vadd.f32 %v512_v34, %v511_v28  ;;  %v1421_v28 = vadd.s32 8, %v1418_v23 }
 0x102   : > { %1071 = vmatmul.mubr.msk.f32.vlgmr.msra.gmra.mrb[0].mxu1 %vm553_vm2, %v525_v30  ;;  %v520_v37 = vadd.f32 %v519_v35, %v518_v29  ;;  %v1424_v29 = vadd.s32 16, %v1418_v23  ;;  %v1427_v30 = vadd.s32 24, %v1418_v23 }
 0x103   : > { %636 = vmatprep.mubr.f32.mxu1 %v1255_v0  ;;  %v514_v38 = vrot.slane %v513_v36, 2 }
 0x104   : > { %v521_v39 = vrot.slane %v520_v37, 2 }
 0x105   : > { %v515_v40 = vadd.f32 %v514_v38, %v513_v36 }
 0x106   : > { %1072 = vmatmul.mubr.msk.f32.gmra.mrb[2].mxu1 %vm553_vm2, %v526_v31  ;;  %v522_v41 = vadd.f32 %v521_v39, %v520_v37 }
 0x107   : > { %642 = vmatprep.mubr.f32.mxu1 %v1255_v0  ;;  %v516_v42 = vrot.slane %v515_v40, 1 }
 0x108   : > { %v523_v43 = vrot.slane %v522_v41, 1 }
 0x109   : > { %v517_v46 = vadd.f32 %v516_v42, %v515_v40 }
 0x10a   : > { %1073 = vmatmul.mubr.msk.f32.gmra.mrb[4].mxu1 %vm553_vm2, %v527_v32  ;;  %v524_v49 = vadd.f32 %v523_v43, %v522_v41 }
 0x10b   : > { %648 = vmatprep.mubr.f32.mxu1 %v1255_v0 }
 0x10e   : > { %1074 = vmatmul.mubr.msk.f32.gmra.mrb[6].mxu1 %vm553_vm2, %v528_v33 }
 0x1d5   : > { %v632_v45 = vpop.f32.mrb[0].mxu1 }
 0x1d6   : > { %v633_v47 = vadd.f32 %v632_v45, %v536_v44  ;;  %v634_v48 = vpop.f32.mrb[1].mxu1 }
 0x1d7   : > { %v635_v50 = vadd.f32 %v634_v48, %v536_v44 }
 0x1d8   : > { %v655_v51 = vadd.f32 %v633_v47, %v517_v46 }
 0x1d9   : > { %v1415_v53 = vadd.f32 %v635_v50, %v524_v49  ;;  %v638_v54 = vpop.f32.mrb[2].mxu1 }
 0x1da   : > { %v639_v55 = vadd.f32 %v638_v54, %v541_v52  ;;  %v640_v56 = vpop.f32.mrb[3].mxu1 }
 0x1db   : > { %v641_v57 = vadd.f32 %v640_v56, %v541_v52 }
 0x1dc   : > { %v657_v58 = vadd.f32 %v639_v55, %v517_v46 }
 0x1dd   : > { %v658_v60 = vadd.f32 %v641_v57, %v524_v49  ;;  %v644_v61 = vpop.f32.mrb[4].mxu1 }
 0x1de   : > { %v645_v62 = vadd.f32 %v644_v61, %v546_v59  ;;  %v646_v63 = vpop.f32.mrb[5].mxu1 }
 0x1df   : > { %v647_v1 = vadd.f32 %v646_v63, %v546_v59 }
 0x1e0   : > { %v659_v2 = vadd.f32 %v645_v62, %v517_v46 }
 0x1e1   : > { %v660_v4 = vadd.f32 %v647_v1, %v524_v49  ;;  %v650_v5 = vpop.f32.mrb[6].mxu1 }
 0x1e2   : > { %v663_v6 = vmin.f32 %v655_v51, %v659_v2  ;;  %v651_v7 = vadd.f32 %v650_v5, %v551_v3  ;;  %v652_v8 = vpop.f32.mrb[7].mxu1 }
 0x1e3   : > { %v672_v9 = vmin.f32 %v1415_v53, %v660_v4  ;;  %v653_v10 = vadd.f32 %v652_v8, %v551_v3  ;;  %v1257_v8 = vmov 1.0|1.0  }
 0x1e4   : > { %v661_v11 = vadd.f32 %v651_v7, %v517_v46 }
 0x1e5   : > { %v662_v12 = vadd.f32 %v653_v10, %v524_v49 }
 0x1e6   : > { %v664_v13 = vmin.f32 %v657_v58, %v661_v11 }
 0x1e7   : > { %v673_v14 = vmin.f32 %v658_v60, %v662_v12 }
 0x1e8   : > { %v665_v15 = vmin.f32 %v663_v6, %v664_v13  ;;  %v790_v13 = vld [vmem:[%s1548_s6] sm:$0xf] }
 0x1e9   : > { %v674_v16 = vmin.f32 %v672_v9, %v673_v14 }
 0x1ea   : > { %v666_v17 = vrot.slane %v665_v15, 4 }
 0x1eb   : > { %v675_v19 = vrot.slane %v674_v16, 4 }
 0x1ec   : > { %v667_v20 = vmin.f32 %v665_v15, %v666_v17 }
 0x1ed   : > { %v676_v21 = vmin.f32 %v674_v16, %v675_v19 }
 0x1ee   : > { %v668_v22 = vrot.slane %v667_v20, 2 }
 0x1ef   : > { %v677_v24 = vrot.slane %v676_v21, 2 }
 0x1f0   : > { %v669_v25 = vmin.f32 %v667_v20, %v668_v22 }
 0x1f1   : > { %v678_v26 = vmin.f32 %v676_v21, %v677_v24 }
 0x1f2   : > { %v670_v27 = vrot.slane %v669_v25, 1 }
 0x1f3   : > { %v679_v31 = vrot.slane %v678_v26, 1 }
 0x1f4   : > { %v671_v32 = vmin.f32 %v669_v25, %v670_v27 }
 0x1f5   : > { %v680_v33 = vmin.f32 %v678_v26, %v679_v31 }
 0x1f6   : > { %vm686_vm4 = vcmp.le.f32.partialorder %v655_v51, %v671_v32  ;;  %vm688_vm5 = vcmp.le.f32.partialorder %v657_v58, %v671_v32  ;;  %vm690_vm6 = vcmp.le.f32.partialorder %v659_v2, %v671_v32  ;;  %vm692_vm7 = vcmp.le.f32.partialorder %v661_v11, %v671_v32 }
 0x1f7   : > { %v694_v34 = vsel %vm686_vm4, %v1418_v23, 32  ;;  %v696_v35 = vsel %vm688_vm5, %v1421_v28, 32  ;;  %v698_v36 = vsel %vm690_vm6, %v1424_v29, 32  ;;  %v700_v37 = vsel %vm692_vm7, %v1427_v30, 32 }
 0x1f8   : > { %vm702_vm8 = vcmp.lt.s32.totalorder %v694_v34, %v698_v36  ;;  %vm704_vm9 = vcmp.lt.s32.totalorder %v696_v35, %v700_v37  ;;  %vm687_vm10 = vcmp.le.f32.partialorder %v1415_v53, %v680_v33  ;;  %vm689_vm11 = vcmp.le.f32.partialorder %v658_v60, %v680_v33 }
 0x1f9   : > { %v703_v38 = vsel %vm702_vm8, %v694_v34, %v698_v36  ;;  %v705_v39 = vsel %vm704_vm9, %v696_v35, %v700_v37  ;;  %vm691_vm12 = vcmp.le.f32.partialorder %v660_v4, %v680_v33  ;;  %vm693_vm13 = vcmp.le.f32.partialorder %v662_v12, %v680_v33 }
 0x1fa   : > { %vm706_vm14 = vcmp.lt.s32.totalorder %v703_v38, %v705_v39  ;;  %v695_v40 = vsel %vm687_vm10, %v1418_v23, 32  ;;  %v697_v41 = vsel %vm689_vm11, %v1421_v28, 32  ;;  %v699_v42 = vsel %vm691_vm12, %v1424_v29, 32 }
 0x1fb   : > { %v707_v43 = vsel %vm706_vm14, %v703_v38, %v705_v39  ;;  %v701_v44 = vsel %vm693_vm13, %v1427_v30, 32  ;;  %vm717_vm15 = vcmp.lt.s32.totalorder %v695_v40, %v699_v42  ;;  %v757_v45 = vsel %vm756_vm3, %v671_v32, 0.0 }
 0x1fc   : > { %v708_v46 = vrot.slane %v707_v43, 4  ;;  %v718_v47 = vsel %vm717_vm15, %v695_v40, %v699_v42  ;;  %vm719_vm0 = vcmp.lt.s32.totalorder %v697_v41, %v701_v44  ;;  %v758_v48 = vsel %vm756_vm3, %v680_v33, 0.0 }
 0x1fd   : > { %v720_v49 = vsel %vm719_vm0, %v697_v41, %v701_v44  ;;  %v759_v50 = vadd.f32 %v758_v48, %v757_v45 }
 0x1fe   : > { %vm709_vm1 = vcmp.lt.s32.totalorder %v707_v43, %v708_v46  ;;  %vm721_vm2 = vcmp.lt.s32.totalorder %v718_v47, %v720_v49 }
 0x1ff   : > { %v710_v51 = vsel %vm709_vm1, %v707_v43, %v708_v46  ;;  %v722_v52 = vsel %vm721_vm2, %v718_v47, %v720_v49  ;;  %760 = vadd.xlane.f32.xlu0 %v759_v50 }
 0x200   : > { %v711_v53 = vrot.slane %v710_v51, 2  ;;  %v723_v54 = vrot.slane %v722_v52, 4 }
 0x202   : > { %vm712_vm4 = vcmp.lt.s32.totalorder %v710_v51, %v711_v53  ;;  %vm724_vm5 = vcmp.lt.s32.totalorder %v722_v52, %v723_v54 }
 0x203   : > { %v725_v55 = vsel %vm724_vm5, %v722_v52, %v723_v54  ;;  %v713_v56 = vsel %vm712_vm4, %v710_v51, %v711_v53  ;;  %vm796_vm5 = vcmask 261120  }
 0x204   : > { %v726_v57 = vrot.slane %v725_v55, 2  ;;  %v714_v58 = vrot.slane %v713_v56, 1 }
 0x206   : > { %vm727_vm6 = vcmp.lt.s32.totalorder %v725_v55, %v726_v57  ;;  %vm715_vm7 = vcmp.lt.s32.totalorder %v713_v56, %v714_v58 }
 0x207   : > { %v728_v59 = vsel %vm727_vm6, %v725_v55, %v726_v57  ;;  %v716_v60 = vsel %vm715_vm7, %v713_v56, %v714_v58  ;;  %vm784_vm6 = vcmask 7168   ;;  %vm770_vm7 = vcmask 0  }
 0x208   : > { %v729_v61 = vrot.slane %v728_v59, 1  ;;  %vm732_vm3 = vcmp.eq.s32.totalorder %v1418_v23, %v716_v60  ;;  %vm734_vm8 = vcmp.eq.s32.totalorder %v1421_v28, %v716_v60  ;;  %vm736_vm9 = vcmp.eq.s32.totalorder %v1424_v29, %v716_v60 }
 0x209   : > { %vm738_vm10 = vcmp.eq.s32.totalorder %v1427_v30, %v716_v60  ;;  %v1077_v62 = vsel %vm734_vm8, 1.0, %v1255_v0  ;;  %v1075_v1 = vsel %vm732_vm3, 1.0, %v1255_v0  ;;  %v1079_v2 = vsel %vm736_vm9, 1.0, %v1255_v0  ;;  %vm1106_vm1 = vmpackc.low %vm734_vm8, %vm732_vm3 }
 0x20a   : > { %vm730_vm11 = vcmp.lt.s32.totalorder %v728_v59, %v729_v61  ;;  %v1081_v3 = vsel %vm738_vm10, 1.0, %v1255_v0  ;;  %vm1110_vm4 = vmpackc.low %vm738_vm10, %vm736_vm9 }
 0x20b   : > { %v731_v63 = vsel %vm730_vm11, %v728_v59, %v729_v61 }
 0x20c   : > { %vm733_vm12 = vcmp.eq.s32.totalorder %v1418_v23, %v731_v63  ;;  %vm735_vm13 = vcmp.eq.s32.totalorder %v1421_v28, %v731_v63  ;;  %vm737_vm14 = vcmp.eq.s32.totalorder %v1424_v29, %v731_v63  ;;  %vm739_vm15 = vcmp.eq.s32.totalorder %v1427_v30, %v731_v63 }
 0x20d   : > { %vm1104_vm0 = vmpackc.low %vm735_vm13, %vm733_vm12  ;;  %v1078_v4 = vsel %vm735_vm13, 1.0, %v1255_v0  ;;  %v1076_v5 = vsel %vm733_vm12, 1.0, %v1255_v0  ;;  %v1080_v6 = vsel %vm737_vm14, 1.0, %v1255_v0  ;;  %v1082_v7 = vsel %vm739_vm15, 1.0, %v1255_v0  ;;  %v789_v0 = vld [vmem:[%s1547_s5] sm:$0xf] }
 0x20e   : > { %1105 = vmatprep.subr.msk.bf16.mxu0 %vm1104_vm0, %v1257_v8  ;;  %v775_v9 = vadd.f32 %v1078_v4, %v1077_v62  ;;  %v772_v10 = vadd.f32 %v1076_v5, %v1075_v1  ;;  %v778_v11 = vadd.f32 %v1080_v6, %v1079_v2  ;;  %v781_v12 = vadd.f32 %v1082_v7, %v1081_v3  ;;  %vm1108_vm2 = vmpackc.low %vm739_vm15, %vm737_vm14 }
 0x20f   : > { %1107 = vmatpush1.bf16.msk.msra.mxu0 %vm1106_vm1, %v1257_v8 }
 0x210   : > { %776 = vadd.xlane.f32.xlu0 %v775_v9  ;;  %1109 = vmatprep.subr.msk.bf16.mxu0 %vm1108_vm2, %v1257_v8 }
 0x211   : > { %773 = vadd.xlane.f32.xlu1 %v772_v10 }
 0x213   : > { %1111 = vmatpush1.bf16.msk.msra.mxu0 %vm1110_vm4, %v1257_v8 }
 0x214   : > { %779 = vadd.xlane.f32.xlu0 %v778_v11 }
 0x215   : > { %782 = vadd.xlane.f32.xlu1 %v781_v12 }
 0x216   : > { %1091 = vmatmul.mubr.msk.f32.vlgmr.msra.gmra.mrb[4].mxu0 %vm796_vm5, %v789_v0 }
 0x22a   : > { %793 = vperm.xlu0 %1172, %v790_v13  }
 0x28c   : > { %v761_v14 = vpop.xlane.xlu0 %760 }
 0x28d   : > { %v762_v15 = vrot.slane %v761_v14, 4 }
 0x28f   : > { %v763_v16 = vadd.f32 %v762_v15, %v761_v14 }
 0x291   : > { %v764_v17 = vrot.slane %v763_v16, 2 }
 0x293   : > { %v765_v18 = vadd.f32 %v764_v17, %v763_v16 }
 0x295   : > { %v766_v19 = vrot.slane %v765_v18, 1 }
 0x297   : > { %v767_v20 = vadd.f32 %v766_v19, %v765_v18 }
 0x299   : > { %1112 = vpush %v767_v20 }
 0x29d   : > { %v777_v21 = vpop.xlane.xlu0 %776 }
 0x29e   : > { %786 = vst.msk [vmem:[%s400_s29 + $0x8] sm:$0xff] %vm784_vm6, %v777_v21  ;;  %v774_v22 = vpop.xlane.xlu1 %773 }
 0x29f   : > { %785 = vst.msk [vmem:[%s400_s29] sm:$0xff] %vm784_vm6, %v774_v22 }
 0x2a1   : > { %v780_v23 = vpop.xlane.xlu0 %779 }
 0x2a2   : > { %787 = vst.msk [vmem:[%s400_s29 + $0x10] sm:$0xff] %vm784_vm6, %v780_v23  ;;  %v783_v24 = vpop.xlane.xlu1 %782 }
 0x2a3   : > { %788 = vst.msk [vmem:[%s400_s29 + $0x18] sm:$0xff] %vm784_vm6, %v783_v24 }
 0x2a9   : > { %v794_v26 = vpop.permute.xlu0 %793 }
 0x2ca   : > { %s1113_s20 = spop %1112 }
 0x2cb   : > { %v769_v25 = vstv %s1113_s20 }
 0x2cc   : > { %771 = vst.msk [vmem:[%s391_s18] sm:$0x1] %vm770_vm7, %v769_v25  ;;  %s1179_s18 = sshll.u32 %s1258_s12, 4  ;;  %s1180_s18 = int_to_ptr.vmem [resolvable:$false] %s1179_s18 }
 0x2cd   : > { %s1181_s20 = scalar_lea.vmem %s1180_s18, 256  ;;  %p1182_p1 = scmp.lt.s32.totalorder %s1497_s28, %s1180_s18 }
 0x2ce   : > { %p1183_p2 = scmp.lt.s32.totalorder %s1181_s20, %s1175_s16 }
 0x2d0   : > { %p1184_p3 = por %p1183_p2, %p1182_p1 }
 0x2d2   : > { %p1185_p5 = pnand %p1184_p3, %p1178_p0 }
 0x2e9   : > { %v866_v27 = vpop.f32.mrb[4].mxu0 }
 0x2ea   : > { %v867_v28 = vadd.f32 %v866_v27, %v794_v26  ;;  %v868_v29 = vpop.f32.mrb[5].mxu0 }
 0x2eb   : > { %v869_v30 = vadd.f32 %v868_v29, %v794_v26 }
 0x2ed   : > { %v873_v31 = vcombine.low %v867_v28, %v869_v30 }
 0x2ef   : > { %875 = vst [vmem:[%s355_s27] sm:$0xff] %v873_v31 }
 0x2f0   : > { %1188 = shalt.err (!%p1185_p5)
}
 0x2f1   : > { %s1189_s0 = scalar_lea.hbm %s1495_s25, 128  ;;  %s1193_s26 = scalar_lea.hbm %s1549_s7, 256 }
 0x2f2   : > { %p1190_p6 = scmp.ne.s32.totalorder %s1495_s25, %s1189_s0  ;;  %p1194_p10 = scmp.lt.u32.totalorder %s1495_s25, %s1549_s7 }
 0x2f3   : > { %p1195_p11 = scmp.lt.u32.totalorder %s1193_s26, %s1189_s0  ;;  %p1197_p13 = scmp.lt.u32.totalorder %s1189_s0, %s1495_s25 }
 0x2f4   : > { %p1191_p7 = pnand %p1190_p6, %p1349_p4 }
 0x2f5   : > { %p1196_p12 = por %p1195_p11, %p1194_p10 }
 0x2f6   : > { %p1192_p9 = pneg %p1191_p7 }
 0x2f7   : > { %p1198_p0 = por %p1197_p13, %p1196_p12 }
 0x2f9   : > { %p1199_p1 = pnand %p1198_p0, %p1192_p9 }
 0x2fb   : > { %1202 = shalt.err (!%p1199_p1)
}
 0x2fc   : > { %1114 = dma.vmem_to_hbm [thread:$0]  (%p1349_p4), %s1497_s28, 128, %s1495_s25, %s877_s15  }
 0x2fd PF: > { %p1120_p2 = scmp.ge.s32.totalorder %s1253_s14, 2  ;;  %s926_s16 = sand.u32 1, %s1233_s30  }
 0x2fe   : > { %s927_s12 = scalar_lea.sflag [#allocation3], %s926_s16 }
 0x2ff   : > { %p1117_p3 = pnand %p1120_p2, %p1356_p8 }
 0x301   : > { %1228 = dma.done.wait (!%p1117_p3), %s927_s12, 128  }
 0x302   : > { %1230 = vsyncadd (!%p1117_p3), %s927_s12, 4294967168  ;;  %s23_s14 = sadd.s32 1, %s1253_s14   ;;  %s1556_s30 = smov %s1237_s10 }
 0x303   : > { %p20_p5 = scmp.ge.s32.totalorder %s23_s14, 4   ;;  %s1557_s10 = smov %s1241_s11 }
 0x304   : > { %s1558_s11 = smov %s1362_s22  ;;  %s1559_s12 = smov %s1249_s13 }
 0x305   : > { %s1560_s13 = smov %s1562_s17  ;;  %22 = sbr.rel (!%p20_p5) target bundleno = 6 (0x6), region = 107 }
 0x30c   :  { %953 = vsyncpa [#allocation3], 1 }
 0x30d   :  { %955 = vsyncpa [#allocation3 + $0x1], 1 }

</bundles_post_ra>
